<compile_context>
chip_gen: v6e
topology: v6e:2x2x1
jax: 0.10.0
libtpu: 0.0.40
codegen_flags: <defaults>
</compile_context>

<pallas_src>
import jax
import jax.numpy as jnp
from jax.experimental import pallas as pl
from jax.experimental.pallas import tpu as pltpu


def _identity_alias_kernel(x_ref, o_ref, flag_ref):
    # Output aliases input -> nothing to compute and nothing to copy.
    # x_ref / o_ref are raw HBM refs (memory_space=pl.ANY), intentionally
    # untouched: their bytes are already identical when the kernel runs.
    del x_ref, o_ref
    flag_ref[0] = jnp.int32(1)  # trivial SMEM store; keeps the body non-empty


def identity(x):
    """Identity forward pass: y = x (zero-HBM-traffic Pallas no-op via aliasing)."""
    if x.size == 0:
        return x  # nothing to do for empty tensors

    return pl.pallas_call(
        _identity_alias_kernel,
        out_shape=jax.ShapeDtypeStruct(x.shape, x.dtype),
        # Raw HBM refs, no tiling / blocking: works for arbitrary shape, rank
        # and dtype with no padding or (8,128) alignment requirements.
        in_specs=[pl.BlockSpec(memory_space=pl.ANY)],
        out_specs=pl.BlockSpec(memory_space=pl.ANY),
        scratch_shapes=[pltpu.SMEM((1,), jnp.int32)],
        # Output buffer IS the input buffer when the input is donated;
        # otherwise XLA inserts the single unavoidable copy for us.
        input_output_aliases={0: 0},
        compiler_params=pltpu.CompilerParams(has_side_effects=True),
        cost_estimate=pl.CostEstimate(flops=0, transcendentals=0, bytes_accessed=0),
    )(x)


if __name__ == "__main__":
    key = jax.random.PRNGKey(0)

    # Small NCHW input consistent with the (VGG-style) module's usage.
    x = jax.random.normal(key, (2, 4, 16, 16), dtype=jnp.float32)
    y = jax.block_until_ready(identity(x))
    assert y.shape == x.shape and y.dtype == x.dtype
    assert bool(jnp.array_equal(y, x))

    # Odd / non-tile-aligned shape: no padding, reshaping, or slicing needed.
    k1, k2 = jax.random.split(key)
    x_odd = jax.random.normal(k1, (3, 5, 17, 19), dtype=jnp.float32)
    y_odd = jax.block_until_ready(identity(x_odd))
    assert bool(jnp.array_equal(y_odd, x_odd))

    # Larger input, different dtype, called under jit (as it would appear
    # inside a bigger model graph).
    x_big = jax.random.normal(k2, (9, 16, 64, 64), dtype=jnp.bfloat16)
    y_big = jax.block_until_ready(jax.jit(identity)(x_big))
    assert y_big.dtype == x_big.dtype
    assert bool(jnp.array_equal(y_big, x_big))

    print("KERNEL_OK")
</pallas_src>

<mosaic_0001>
module attributes {stable_mosaic.version = 11 : i64} {
  func.func @_identity_alias_kernel(%arg0: memref<2x4x16x16xf32, #tpu.memory_space<any>>, %arg1: memref<2x4x16x16xf32, #tpu.memory_space<any>>, %arg2: memref<1xi32, #tpu.memory_space<smem>>) attributes {dimension_semantics = [], scalar_prefetch = 0 : i64, scratch_operands = 1 : i64, tpu.core_type = #tpu.core_type<tc>} {
    %c1_i32 = arith.constant 1 : i32
    %c0 = arith.constant 0 : index
    %0 = memref.load %arg2[%c0] : memref<1xi32, #tpu.memory_space<smem>>
    memref.store %c1_i32, %arg2[%c0] : memref<1xi32, #tpu.memory_space<smem>>
    return
  }
}

</mosaic_0001>

<bundles_post_ra>
// kernel: tpu_custom_call.1
= control target key start
LH: loop header
LB: loop body
LE: loop exit
PB: predicated region body
PF: predicated region fallthrough
CT: control target
= control target key end

     0   :  { %s18_s0 = inlined_call_operand.hbm [shape: f32[2,4,16,16], index: 0, kind: input, shape index: {}, may-alias: {0,1}]   ;;  %s19_s1 = inlined_call_operand.hbm [shape: f32[2,4,16,16], index: 1, kind: output, shape index: {}, may-alias: {0,1}]  }

</bundles_post_ra>
